<compile_context>
chip_gen: v7x
topology: tpu7x:2x2x1
jax: 0.10.0
libtpu: 0.0.40
codegen_flags: <defaults>
</compile_context>

<pallas_src>
import functools

import jax
import jax.numpy as jnp
import numpy as np
from jax.experimental import pallas as pl
from jax.experimental.pallas import tpu as pltpu

WIN_SIZE = 11
WIN_SIGMA = 1.5
K1, K2 = 0.01, 0.03
DATA_RANGE = 1.0
C1 = (K1 * DATA_RANGE) ** 2
C2 = (K2 * DATA_RANGE) ** 2


def _gaussian_window(size=WIN_SIZE, sigma=WIN_SIGMA):
    coords = np.arange(size, dtype=np.float64) - size // 2
    g = np.exp(-(coords ** 2) / (2.0 * sigma ** 2))
    return (g / g.sum()).astype(np.float32)


_GAUSS = _gaussian_window()


def _conv_matrix_np(g, n):
    """VALID 1-D correlation as a dense (n, n - win + 1) matrix: m[w, j] = g[w - j]."""
    win = g.shape[0]
    nv = n - win + 1
    m = np.zeros((n, nv), dtype=np.float32)
    for j in range(nv):
        m[j:j + win, j] = g
    return m


def _block_diag_np(base, reps):
    n, nv = base.shape
    out = np.zeros((reps * n, reps * nv), dtype=base.dtype)
    for j in range(reps):
        out[j * n:(j + 1) * n, j * nv:(j + 1) * nv] = base
    return out


def _cdiv(a, b):
    return (a + b - 1) // b


def _combined_loss_kernel(r_ref, x_ref, bt_ref, at_ref, o_ref, *,
                          tg, h, hv, lp, w, wv, bc, needs_mask):
    """One grid step: `tg` lane-packed groups of `lp` (H, W) slices.

    r_ref/x_ref : (tg, h, lp*w)   f32 inputs in [-1, 1] (zeros for padded slices)
    bt_ref      : (lp*w, lp*wv)   bf16 block-diagonal Gaussian valid-conv (W pass)
    at_ref      : (tg, hv, h)     bf16 Gaussian valid-conv (H pass), pre-broadcast
    o_ref       : (1, 3)          SMEM partial sums [sq_err, abs_err, ssim]
    """
    lpw = lp * w
    lpwv = lp * wv

    r = r_ref[...]
    x = x_ref[...]

    # ---- MSE / L1 partial sums (padded slices are zero in both -> contribute 0).
    d = r - x
    sq_sum = jnp.sum(d * d)
    ab_sum = jnp.sum(jnp.abs(d))

    # ---- SSIM on [0, 1]-scaled images: both separable passes on the MXU.
    r01 = (r + 1.0) * 0.5
    x01 = (x + 1.0) * 0.5

    bt = bt_ref[...]                      # (lpw, lpwv)  bf16
    at = at_ref[...]                      # (tg, hv, h)  bf16

    def filt(z):
        # W pass: one 2-D matmul against the block-diagonal valid-conv matrix.
        zb = z.astype(jnp.bfloat16).reshape(tg * h, lpw)
        tw = jnp.dot(zb, bt, preferred_element_type=jnp.float32)      # (tg*h, lpwv)
        # H pass: batched matmul contracting H (one (hv,h)x(h,lpwv) per group).
        twb = tw.reshape(tg, h, lpwv).astype(jnp.bfloat16)
        return jax.lax.dot_general(
            at, twb,
            dimension_numbers=(((2,), (1,)), ((0,), (0,))),
            preferred_element_type=jnp.float32)                        # (tg, hv, lpwv)

    mu1 = filt(r01)
    mu2 = filt(x01)
    e11 = filt(r01 * r01)
    e22 = filt(x01 * x01)
    e12 = filt(r01 * x01)

    mu1_sq = mu1 * mu1
    mu2_sq = mu2 * mu2
    mu12 = mu1 * mu2
    s1 = e11 - mu1_sq
    s2 = e22 - mu2_sq
    s12 = e12 - mu12

    # Single division per SSIM pixel.
    num = (2.0 * mu12 + C1) * (2.0 * s12 + C2)
    den = (mu1_sq + mu2_sq + C1) * (s1 + s2 + C2)
    ssim_map = num / den

    if needs_mask:
        # Padded slices sit at the tail of their group, so validity is a per-group
        # column threshold.  Built from iotas + program_id: no mask DMA stream and
        # no integer division.
        g0 = pl.program_id(0) * tg
        grp = jax.lax.broadcasted_iota(jnp.int32, (tg, hv, lpwv), 0)
        col = jax.lax.broadcasted_iota(jnp.int32, (tg, hv, lpwv), 2)
        n_valid_cols = jnp.clip(bc - (g0 + grp) * lp, 0, lp) * wv
        ssim_map = jnp.where(col < n_valid_cols, ssim_map, 0.0)

    o_ref[0, 0] = sq_sum
    o_ref[0, 1] = ab_sum
    o_ref[0, 2] = jnp.sum(ssim_map)


def combined_loss(recon, x, alpha=0.5, beta=0.3, gamma=0.2, *,
                  vmem_limit_bytes=32 * 1024 * 1024,
                  live_budget_bytes=16 * 1024 * 1024):
    """recon, x: (B, C, H, W) float32 in roughly [-1, 1]. Returns the scalar loss."""
    B, C, H, W = x.shape
    assert H >= WIN_SIZE and W >= WIN_SIZE, "spatial dims must be >= win_size (11)"
    Hv, Wv = H - WIN_SIZE + 1, W - WIN_SIZE + 1
    BC = B * C

    # Lane packing: LP slices side by side along lanes (lane-dense for small W).
    LP = max(1, min(max(1, 128 // W), BC))
    G = _cdiv(BC, LP)                       # number of lane-groups

    # Groups per grid step from a crude live-set model: 2 inputs x 2 pipeline
    # buffers + ~16x block of f32/bf16 intermediates (maps, tw, 5 filtered maps,
    # SSIM math).  Kept well under the explicit scoped-VMEM limit below.
    group_bytes = H * LP * W * 4
    live_factor = 20
    TG = max(1, min(G, live_budget_bytes // (live_factor * group_bytes)))
    num_blocks = _cdiv(G, TG)
    if num_blocks == 1 and G >= 2:          # >=2 blocks so v7x megacore uses both TCs
        TG = _cdiv(G, 2)
        num_blocks = _cdiv(G, TG)
    G_pad = num_blocks * TG
    S_pad = G_pad * LP
    needs_mask = (S_pad != BC)

    LPW, LPWv = LP * W, LP * Wv

    # Constant filter matrices: bf16 MXU operands, f32 accumulation.
    bt_block = jnp.asarray(_block_diag_np(_conv_matrix_np(_GAUSS, W), LP),
                           dtype=jnp.bfloat16)                          # (LP*W, LP*Wv)
    at = jnp.asarray(_conv_matrix_np(_GAUSS, H).T, dtype=jnp.bfloat16)  # (Hv, H)
    at_b = jnp.broadcast_to(at[None], (TG, Hv, H))                      # DMA'd once, stays resident

    # Pack inputs: (BC, H, W) -> (G_pad, H, LP*W); padded slices are zeros.
    # (Inputs of this module are f32; if bf16 upstream, drop the astype and upcast in-kernel.)
    def pack(a):
        a = a.reshape(BC, H, W).astype(jnp.float32)
        if S_pad != BC:
            a = jnp.pad(a, ((0, S_pad - BC), (0, 0), (0, 0)))
        return a.reshape(G_pad, LP, H, W).transpose(0, 2, 1, 3).reshape(G_pad, H, LPW)

    r_packed = pack(recon)
    x_packed = pack(x)

    kernel = functools.partial(
        _combined_loss_kernel, tg=TG, h=H, hv=Hv, lp=LP, w=W, wv=Wv,
        bc=BC, needs_mask=needs_mask)

    flops = int(
        8 * S_pad * H * W                                      # MSE/L1 + map construction
        + 2 * 5 * G_pad * (H * LPW * LPWv + Hv * H * LPWv)     # both MXU passes x 5 maps
        + 22 * G_pad * Hv * LPWv)                              # SSIM pixel math
    bytes_accessed = int(2 * G_pad * H * LPW * 4
                         + bt_block.size * 2 + at_b.size * 2 + num_blocks * 3 * 4)

    partials = pl.pallas_call(
        kernel,
        out_shape=jax.ShapeDtypeStruct((num_blocks, 3), jnp.float32),
        grid=(num_blocks,),
        in_specs=[
            pl.BlockSpec((TG, H, LPW), lambda i: (i, 0, 0)),
            pl.BlockSpec((TG, H, LPW), lambda i: (i, 0, 0)),
            pl.BlockSpec((LPW, LPWv), lambda i: (0, 0)),
            pl.BlockSpec((TG, Hv, H), lambda i: (0, 0, 0)),
        ],
        out_specs=pl.BlockSpec((1, 3), lambda i: (i, 0), memory_space=pltpu.SMEM),
        compiler_params=pltpu.CompilerParams(
            dimension_semantics=("parallel",),
            vmem_limit_bytes=vmem_limit_bytes),
        cost_estimate=pl.CostEstimate(flops=flops, transcendentals=0,
                                      bytes_accessed=bytes_accessed),
    )(r_packed, x_packed, bt_block, at_b)

    sums = jnp.sum(partials, axis=0)                 # final 3-element reduce in plain JAX
    n_elem = BC * H * W
    mse = sums[0] / n_elem
    l1 = sums[1] / n_elem
    ssim_val = sums[2] / (BC * Hv * Wv)
    return alpha * mse + beta * l1 + gamma * (1.0 - ssim_val)


def _reference_loss(recon, x, alpha=0.5, beta=0.3, gamma=0.2):
    """Pure-JAX f32 reference (same math, no Pallas) for sanity checking."""
    B, C, H, W = x.shape
    A = jnp.asarray(_conv_matrix_np(_GAUSS, H).T)    # (Hv, H)
    Bm = jnp.asarray(_conv_matrix_np(_GAUSS, W).T)   # (Wv, W)

    m = jnp.mean((recon - x) ** 2)
    l = jnp.mean(jnp.abs(recon - x))

    r01 = (recon.reshape(B * C, H, W) + 1.0) * 0.5
    x01 = (x.reshape(B * C, H, W) + 1.0) * 0.5

    def filt(z):
        return jnp.einsum("ph,bhw,qw->bpq", A, z, Bm,
                          precision=jax.lax.Precision.HIGHEST)

    mu1, mu2 = filt(r01), filt(x01)
    s1 = filt(r01 * r01) - mu1 ** 2
    s2 = filt(x01 * x01) - mu2 ** 2
    s12 = filt(r01 * x01) - mu1 * mu2
    cs = (2 * s12 + C2) / (s1 + s2 + C2)
    ssim_map = ((2 * mu1 * mu2 + C1) / (mu1 ** 2 + mu2 ** 2 + C1)) * cs
    s = jnp.mean(ssim_map)
    return alpha * m + beta * l + gamma * (1.0 - s)


if __name__ == "__main__":
    key = jax.random.PRNGKey(0)
    k1, k2, k3, k4 = jax.random.split(key, 4)

    # Config 1: UCSD ped2-style grayscale frames, tiny spatial extent.
    B, C, H, W = 2, 1, 16, 16
    x = jax.random.uniform(k1, (B, C, H, W), jnp.float32, minval=-1.0, maxval=1.0)
    recon = jnp.clip(x + 0.1 * jax.random.normal(k2, x.shape, jnp.float32), -1.0, 1.0)
    loss = jax.block_until_ready(combined_loss(recon, x))
    ref = jax.block_until_ready(_reference_loss(recon, x))
    # bf16 MXU operands with f32 accumulation -> ~1e-3-level SSIM error is expected.
    np.testing.assert_allclose(np.asarray(loss), np.asarray(ref), rtol=1e-2, atol=3e-3)

    # Config 2: exercises slice padding (BC % LP != 0) and a multi-block grid.
    B, C, H, W = 5, 1, 24, 40
    x = jax.random.uniform(k3, (B, C, H, W), jnp.float32, minval=-1.0, maxval=1.0)
    recon = jnp.clip(x + 0.1 * jax.random.normal(k4, x.shape, jnp.float32), -1.0, 1.0)
    loss = jax.block_until_ready(combined_loss(recon, x))
    ref = jax.block_until_ready(_reference_loss(recon, x))
    np.testing.assert_allclose(np.asarray(loss), np.asarray(ref), rtol=1e-2, atol=3e-3)

    print("KERNEL_OK")
</pallas_src>

<mosaic_0001>
module attributes {stable_mosaic.version = 11 : i64} {
  func.func @_combined_loss_kernel(%arg0: i32, %arg1: memref<1x16x32xf32, #tpu.memory_space<vmem>>, %arg2: memref<1x16x32xf32, #tpu.memory_space<vmem>>, %arg3: memref<32x12xbf16, #tpu.memory_space<vmem>>, %arg4: memref<1x6x16xbf16, #tpu.memory_space<vmem>>, %arg5: memref<1x3xf32, #tpu.memory_space<smem>>) attributes {dimension_semantics = [#tpu.dimension_semantics<parallel>], iteration_bounds = array<i64: 1>, scalar_prefetch = 0 : i64, scratch_operands = 0 : i64, tpu.core_type = #tpu.core_type<tc>, window_params = [{transform_indices = @transform_0, window_bounds = array<i64: 1, 16, 32>}, {transform_indices = @transform_1, window_bounds = array<i64: 1, 16, 32>}, {pipeline_mode = #tpu.pipeline_mode<synchronous>, transform_indices = @transform_2, window_bounds = array<i64: 32, 12>}, {pipeline_mode = #tpu.pipeline_mode<synchronous>, transform_indices = @transform_3, window_bounds = array<i64: 1, 6, 16>}, {transform_indices = @transform_4, window_bounds = array<i64: 1, 3>}]} {
    %c0 = arith.constant 0 : index
    %c0_0 = arith.constant 0 : index
    %c0_1 = arith.constant 0 : index
    %0 = vector.load %arg1[%c0, %c0_0, %c0_1] : memref<1x16x32xf32, #tpu.memory_space<vmem>>, vector<1x16x32xf32>
    %c0_2 = arith.constant 0 : index
    %c0_3 = arith.constant 0 : index
    %c0_4 = arith.constant 0 : index
    %1 = vector.load %arg2[%c0_2, %c0_3, %c0_4] : memref<1x16x32xf32, #tpu.memory_space<vmem>>, vector<1x16x32xf32>
    %2 = arith.subf %0, %1 : vector<1x16x32xf32>
    %3 = arith.mulf %2, %2 : vector<1x16x32xf32>
    %4 = vector.shape_cast %3 : vector<1x16x32xf32> to vector<1x1x16x32xf32>
    %cst = arith.constant dense<0.000000e+00> : vector<1xf32>
    %5 = vector.multi_reduction <add>, %4, %cst [1, 2, 3] : vector<1x1x16x32xf32> to vector<1xf32>
    %6 = vector.shape_cast %5 : vector<1xf32> to vector<1x1x1x1xf32>
    %7 = vector.extract %6[0, 0, 0, 0] : f32 from vector<1x1x1x1xf32>
    %8 = math.absf %2 : vector<1x16x32xf32>
    %9 = vector.shape_cast %8 : vector<1x16x32xf32> to vector<1x1x16x32xf32>
    %cst_5 = arith.constant dense<0.000000e+00> : vector<1xf32>
    %10 = vector.multi_reduction <add>, %9, %cst_5 [1, 2, 3] : vector<1x1x16x32xf32> to vector<1xf32>
    %11 = vector.shape_cast %10 : vector<1xf32> to vector<1x1x1x1xf32>
    %12 = vector.extract %11[0, 0, 0, 0] : f32 from vector<1x1x1x1xf32>
    %cst_6 = arith.constant 1.000000e+00 : f32
    %13 = vector.broadcast %cst_6 : f32 to vector<1x16x32xf32>
    %14 = arith.addf %0, %13 : vector<1x16x32xf32>
    %cst_7 = arith.constant 5.000000e-01 : f32
    %15 = vector.broadcast %cst_7 : f32 to vector<1x16x32xf32>
    %16 = arith.mulf %14, %15 : vector<1x16x32xf32>
    %cst_8 = arith.constant 1.000000e+00 : f32
    %17 = vector.broadcast %cst_8 : f32 to vector<1x16x32xf32>
    %18 = arith.addf %1, %17 : vector<1x16x32xf32>
    %cst_9 = arith.constant 5.000000e-01 : f32
    %19 = vector.broadcast %cst_9 : f32 to vector<1x16x32xf32>
    %20 = arith.mulf %18, %19 : vector<1x16x32xf32>
    %c0_10 = arith.constant 0 : index
    %c0_11 = arith.constant 0 : index
    %21 = vector.load %arg3[%c0_10, %c0_11] : memref<32x12xbf16, #tpu.memory_space<vmem>>, vector<32x12xbf16>
    %c0_12 = arith.constant 0 : index
    %c0_13 = arith.constant 0 : index
    %c0_14 = arith.constant 0 : index
    %22 = vector.load %arg4[%c0_12, %c0_13, %c0_14] : memref<1x6x16xbf16, #tpu.memory_space<vmem>>, vector<1x6x16xbf16>
    %23 = arith.truncf %16 : vector<1x16x32xf32> to vector<1x16x32xbf16>
    %24 = vector.shape_cast %23 : vector<1x16x32xbf16> to vector<16x32xbf16>
    %cst_15 = arith.constant dense<0.000000e+00> : vector<16x12xf32>
    %25 = tpu.matmul %24, %21, %cst_15 {dimension_numbers = #tpu.dot_dimension_numbers<[1], [0], [0], [1], [0, 0, 1, 1], [], []>} : vector<16x32xbf16>, vector<32x12xbf16>, vector<16x12xf32> -> vector<16x12xf32>
    %26 = vector.shape_cast %25 : vector<16x12xf32> to vector<1x16x12xf32>
    %27 = arith.truncf %26 : vector<1x16x12xf32> to vector<1x16x12xbf16>
    %cst_16 = arith.constant dense<0.000000e+00> : vector<1x6x12xf32>
    %28 = tpu.matmul %22, %27, %cst_16 {dimension_numbers = #tpu.dot_dimension_numbers<[2], [1], [1], [2], [0, 0, 0, 1, 1, 2], [0], [0]>} : vector<1x6x16xbf16>, vector<1x16x12xbf16>, vector<1x6x12xf32> -> vector<1x6x12xf32>
    %29 = arith.truncf %20 : vector<1x16x32xf32> to vector<1x16x32xbf16>
    %30 = vector.shape_cast %29 : vector<1x16x32xbf16> to vector<16x32xbf16>
    %cst_17 = arith.constant dense<0.000000e+00> : vector<16x12xf32>
    %31 = tpu.matmul %30, %21, %cst_17 {dimension_numbers = #tpu.dot_dimension_numbers<[1], [0], [0], [1], [0, 0, 1, 1], [], []>} : vector<16x32xbf16>, vector<32x12xbf16>, vector<16x12xf32> -> vector<16x12xf32>
    %32 = vector.shape_cast %31 : vector<16x12xf32> to vector<1x16x12xf32>
    %33 = arith.truncf %32 : vector<1x16x12xf32> to vector<1x16x12xbf16>
    %cst_18 = arith.constant dense<0.000000e+00> : vector<1x6x12xf32>
    %34 = tpu.matmul %22, %33, %cst_18 {dimension_numbers = #tpu.dot_dimension_numbers<[2], [1], [1], [2], [0, 0, 0, 1, 1, 2], [0], [0]>} : vector<1x6x16xbf16>, vector<1x16x12xbf16>, vector<1x6x12xf32> -> vector<1x6x12xf32>
    %35 = arith.mulf %16, %16 : vector<1x16x32xf32>
    %36 = arith.truncf %35 : vector<1x16x32xf32> to vector<1x16x32xbf16>
    %37 = vector.shape_cast %36 : vector<1x16x32xbf16> to vector<16x32xbf16>
    %cst_19 = arith.constant dense<0.000000e+00> : vector<16x12xf32>
    %38 = tpu.matmul %37, %21, %cst_19 {dimension_numbers = #tpu.dot_dimension_numbers<[1], [0], [0], [1], [0, 0, 1, 1], [], []>} : vector<16x32xbf16>, vector<32x12xbf16>, vector<16x12xf32> -> vector<16x12xf32>
    %39 = vector.shape_cast %38 : vector<16x12xf32> to vector<1x16x12xf32>
    %40 = arith.truncf %39 : vector<1x16x12xf32> to vector<1x16x12xbf16>
    %cst_20 = arith.constant dense<0.000000e+00> : vector<1x6x12xf32>
    %41 = tpu.matmul %22, %40, %cst_20 {dimension_numbers = #tpu.dot_dimension_numbers<[2], [1], [1], [2], [0, 0, 0, 1, 1, 2], [0], [0]>} : vector<1x6x16xbf16>, vector<1x16x12xbf16>, vector<1x6x12xf32> -> vector<1x6x12xf32>
    %42 = arith.mulf %20, %20 : vector<1x16x32xf32>
    %43 = arith.truncf %42 : vector<1x16x32xf32> to vector<1x16x32xbf16>
    %44 = vector.shape_cast %43 : vector<1x16x32xbf16> to vector<16x32xbf16>
    %cst_21 = arith.constant dense<0.000000e+00> : vector<16x12xf32>
    %45 = tpu.matmul %44, %21, %cst_21 {dimension_numbers = #tpu.dot_dimension_numbers<[1], [0], [0], [1], [0, 0, 1, 1], [], []>} : vector<16x32xbf16>, vector<32x12xbf16>, vector<16x12xf32> -> vector<16x12xf32>
    %46 = vector.shape_cast %45 : vector<16x12xf32> to vector<1x16x12xf32>
    %47 = arith.truncf %46 : vector<1x16x12xf32> to vector<1x16x12xbf16>
    %cst_22 = arith.constant dense<0.000000e+00> : vector<1x6x12xf32>
    %48 = tpu.matmul %22, %47, %cst_22 {dimension_numbers = #tpu.dot_dimension_numbers<[2], [1], [1], [2], [0, 0, 0, 1, 1, 2], [0], [0]>} : vector<1x6x16xbf16>, vector<1x16x12xbf16>, vector<1x6x12xf32> -> vector<1x6x12xf32>
    %49 = arith.mulf %16, %20 : vector<1x16x32xf32>
    %50 = arith.truncf %49 : vector<1x16x32xf32> to vector<1x16x32xbf16>
    %51 = vector.shape_cast %50 : vector<1x16x32xbf16> to vector<16x32xbf16>
    %cst_23 = arith.constant dense<0.000000e+00> : vector<16x12xf32>
    %52 = tpu.matmul %51, %21, %cst_23 {dimension_numbers = #tpu.dot_dimension_numbers<[1], [0], [0], [1], [0, 0, 1, 1], [], []>} : vector<16x32xbf16>, vector<32x12xbf16>, vector<16x12xf32> -> vector<16x12xf32>
    %53 = vector.shape_cast %52 : vector<16x12xf32> to vector<1x16x12xf32>
    %54 = arith.truncf %53 : vector<1x16x12xf32> to vector<1x16x12xbf16>
    %cst_24 = arith.constant dense<0.000000e+00> : vector<1x6x12xf32>
    %55 = tpu.matmul %22, %54, %cst_24 {dimension_numbers = #tpu.dot_dimension_numbers<[2], [1], [1], [2], [0, 0, 0, 1, 1, 2], [0], [0]>} : vector<1x6x16xbf16>, vector<1x16x12xbf16>, vector<1x6x12xf32> -> vector<1x6x12xf32>
    %56 = arith.mulf %28, %28 : vector<1x6x12xf32>
    %57 = arith.mulf %34, %34 : vector<1x6x12xf32>
    %58 = arith.mulf %28, %34 : vector<1x6x12xf32>
    %59 = arith.subf %41, %56 : vector<1x6x12xf32>
    %60 = arith.subf %48, %57 : vector<1x6x12xf32>
    %61 = arith.subf %55, %58 : vector<1x6x12xf32>
    %cst_25 = arith.constant 2.000000e+00 : f32
    %62 = vector.broadcast %cst_25 : f32 to vector<1x6x12xf32>
    %63 = arith.mulf %62, %58 : vector<1x6x12xf32>
    %cst_26 = arith.constant 9.99999974E-5 : f32
    %64 = vector.broadcast %cst_26 : f32 to vector<1x6x12xf32>
    %65 = arith.addf %63, %64 : vector<1x6x12xf32>
    %cst_27 = arith.constant 2.000000e+00 : f32
    %66 = vector.broadcast %cst_27 : f32 to vector<1x6x12xf32>
    %67 = arith.mulf %66, %61 : vector<1x6x12xf32>
    %cst_28 = arith.constant 8.99999984E-4 : f32
    %68 = vector.broadcast %cst_28 : f32 to vector<1x6x12xf32>
    %69 = arith.addf %67, %68 : vector<1x6x12xf32>
    %70 = arith.mulf %65, %69 : vector<1x6x12xf32>
    %71 = arith.addf %56, %57 : vector<1x6x12xf32>
    %cst_29 = arith.constant 9.99999974E-5 : f32
    %72 = vector.broadcast %cst_29 : f32 to vector<1x6x12xf32>
    %73 = arith.addf %71, %72 : vector<1x6x12xf32>
    %74 = arith.addf %59, %60 : vector<1x6x12xf32>
    %cst_30 = arith.constant 8.99999984E-4 : f32
    %75 = vector.broadcast %cst_30 : f32 to vector<1x6x12xf32>
    %76 = arith.addf %74, %75 : vector<1x6x12xf32>
    %77 = arith.mulf %73, %76 : vector<1x6x12xf32>
    %78 = arith.divf %70, %77 : vector<1x6x12xf32>
    %c0_31 = arith.constant 0 : index
    %c0_32 = arith.constant 0 : index
    %79 = memref.load %arg5[%c0_31, %c0_32] : memref<1x3xf32, #tpu.memory_space<smem>>
    memref.store %7, %arg5[%c0_31, %c0_32] : memref<1x3xf32, #tpu.memory_space<smem>>
    %c0_33 = arith.constant 0 : index
    %c1 = arith.constant 1 : index
    %80 = memref.load %arg5[%c0_33, %c1] : memref<1x3xf32, #tpu.memory_space<smem>>
    memref.store %12, %arg5[%c0_33, %c1] : memref<1x3xf32, #tpu.memory_space<smem>>
    %81 = vector.shape_cast %78 : vector<1x6x12xf32> to vector<1x1x6x12xf32>
    %cst_34 = arith.constant dense<0.000000e+00> : vector<1xf32>
    %82 = vector.multi_reduction <add>, %81, %cst_34 [1, 2, 3] : vector<1x1x6x12xf32> to vector<1xf32>
    %83 = vector.shape_cast %82 : vector<1xf32> to vector<1x1x1x1xf32>
    %84 = vector.extract %83[0, 0, 0, 0] : f32 from vector<1x1x1x1xf32>
    %c0_35 = arith.constant 0 : index
    %c2 = arith.constant 2 : index
    %85 = memref.load %arg5[%c0_35, %c2] : memref<1x3xf32, #tpu.memory_space<smem>>
    memref.store %84, %arg5[%c0_35, %c2] : memref<1x3xf32, #tpu.memory_space<smem>>
    return
  }
  func.func @transform_0(%arg0: i32) -> (i32, i32, i32) {
    %c0_i32 = arith.constant 0 : i32
    %c0_i32_0 = arith.constant 0 : i32
    %c0_i32_1 = arith.constant 0 : i32
    return %arg0, %c0_i32, %c0_i32_0 : i32, i32, i32
  }
  func.func @transform_1(%arg0: i32) -> (i32, i32, i32) {
    %c0_i32 = arith.constant 0 : i32
    %c0_i32_0 = arith.constant 0 : i32
    %c0_i32_1 = arith.constant 0 : i32
    return %arg0, %c0_i32, %c0_i32_0 : i32, i32, i32
  }
  func.func @transform_2(%arg0: i32) -> (i32, i32) {
    %c0_i32 = arith.constant 0 : i32
    %c0_i32_0 = arith.constant 0 : i32
    %c0_i32_1 = arith.constant 0 : i32
    return %c0_i32, %c0_i32_0 : i32, i32
  }
  func.func @transform_3(%arg0: i32) -> (i32, i32, i32) {
    %c0_i32 = arith.constant 0 : i32
    %c0_i32_0 = arith.constant 0 : i32
    %c0_i32_1 = arith.constant 0 : i32
    %c0_i32_2 = arith.constant 0 : i32
    return %c0_i32, %c0_i32_0, %c0_i32_1 : i32, i32, i32
  }
  func.func @transform_4(%arg0: i32) -> (i32, i32) {
    %c0_i32 = arith.constant 0 : i32
    %c0_i32_0 = arith.constant 0 : i32
    return %arg0, %c0_i32 : i32, i32
  }
}

</mosaic_0001>

<bundles_post_ra>
// kernel: tpu_custom_call.1
= control target key start
LH: loop header
LB: loop body
LE: loop exit
PB: predicated region body
PF: predicated region fallthrough
CT: control target
= control target key end

     0   :  { %9 = vsyncpa [#allocation3], 0  ;;  %s883_s0 = inlined_call_operand.vmem [shape: f32[1,16,32], index: 0, kind: input, shape index: {}]   ;;  %s884_s1 = inlined_call_operand.hbm [shape: f32[1,16,32], index: 1, kind: input, shape index: {}]   ;;  %s885_s2 = inlined_call_operand.vmem [shape: bf16[32,12], index: 2, kind: input, shape index: {}]   ;;  %s886_s3 = inlined_call_operand.vmem [shape: bf16[1,6,16], index: 3, kind: input, shape index: {}]   ;;  %s887_s4 = inlined_call_operand.hbm [shape: f32[1,3], index: 4, kind: output, shape index: {}]  }
   0x1   :  { %10 = vsyncpa [#allocation4], 0  ;;  %s741_s15 = smov [#allocation2]   ;;  %s705_s19 = scalar_lea.hbm %s884_s1, 256 }
   0x2   :  { %s18_s16 = sshll.u32 %s741_s15, 4  ;;  %p706_p0 = scmp.ne.s32.totalorder %s884_s1, %s705_s19  ;;  %s19_s16 = int_to_ptr.vmem [resolvable:$true] %s18_s16 }
   0x3   :  { %p709_p1 = scmp.lt.u32.totalorder %s705_s19, %s884_s1 }
   0x5   :  { %p711_p2 = pnand %p709_p1, %p706_p0 }
   0x7   :  { %714 = shalt.err (!%p711_p2)
}
   0x8   :  { %s715_s24 = scalar_lea.vmem %s19_s16, 256  ;;  %p720_p4 = scmp.lt.s32.totalorder %s19_s16, %s19_s16 }
   0x9   :  { %p716_p3 = scmp.ne.s32.totalorder %s19_s16, %s715_s24  ;;  %p721_p5 = scmp.lt.s32.totalorder %s715_s24, %s715_s24 }
   0xb   :  { %p722_p6 = por %p721_p5, %p720_p4 }
   0xd   :  { %p723_p7 = pnand %p722_p6, %p716_p3 }
   0xf   :  { %726 = shalt.err (!%p723_p7)
}
  0x10   :  { %s742_s25 = smov 128   ;;  %s743_s26 = smov 8  }
  0x11   :  { %24 = dma.hbm_to_vmem [thread:$0]  %s884_s1, 256, %s19_s16, [#allocation3], %s742_s25, %s742_s25, %s743_s26  }
  0x12   :  { %737 = dma.done.wait [#allocation3], 256  }
  0x13   :  { %738 = vsyncadd [#allocation3], 4294967040  ;;  %v744_v0 = vmov 0.0   ;;  %vm745_vm0 = vmmov 0   ;;  %v701_v1 = vld [vmem:[%s885_s2] sm:$0xff]   ;;  %v702_v2 = vld [vmem:[%s885_s2 + $0x8] sm:$0xff]  }
  0x14   :  { %619 = vmatprep.subr.bf16.mxu0 %v744_v0  ;;  %623 = vmatprep.mubr.msk.bf16.mxu0 %vm745_vm0, %v744_v0  ;;  %v799_v3 = vld [vmem:[%s883_s0] sm:$0xff]  ;;  %v804_v4 = vld [vmem:[%s883_s0 + $0x8] sm:$0xff]  ;;  %vm41_vm1 = vcmask 261120   ;;  %vm139_vm2 = vcmask 130048   ;;  %vm555_vm3 = vcmask 95232   ;;  %s727_s14 = scalar_lea.hbm %s887_s4, 16 }
  0x15   :  { %627 = vmatprep.subr.bf16.mxu1 %v744_v0  ;;  %629 = vmatprep.mubr.msk.bf16.mxu1 %vm745_vm0, %v744_v0  ;;  %v68_v5 = vadd.f32 1.0, %v799_v3  ;;  %v69_v6 = vadd.f32 1.0, %v804_v4  ;;  %v813_v12 = vld [vmem:[#allocation2] sm:$0xff]  ;;  %v815_v13 = vld [vmem:[#allocation2 + $0x8] sm:$0xff]  ;;  %p728_p8 = scmp.ne.s32.totalorder %s887_s4, %s727_s14  ;;  %p731_p9 = scmp.lt.u32.totalorder %s727_s14, %s887_s4 }
  0x16   :  { %620 = vmatpush3.bf16.msra.mxu0 %v701_v1  ;;  %v72_v17 = vadd.f32 1.0, %v813_v12  ;;  %v73_v18 = vadd.f32 1.0, %v815_v13  ;;  %v822_v19 = vld [vmem:[%s886_s3] sm:$0x7]  ;;  %v37_v56 = vsub.f32 %v799_v3, %v813_v12  ;;  %v38_v57 = vsub.f32 %v804_v4, %v815_v13 }
  0x17   :  { %621 = vmatprep.subr.bf16.mxu0 %v744_v0  ;;  %v70_v7 = vmul.f32 0.5, %v68_v5  ;;  %v71_v8 = vmul.f32 0.5, %v69_v6  ;;  %p733_p10 = pnand %p731_p9, %p728_p8 }
  0x18   :  { %v74_v20 = vmul.f32 0.5, %v72_v17  ;;  %v75_v21 = vmul.f32 0.5, %v73_v18  ;;  %v39_v58 = vmul.f32 %v37_v56, %v37_v56  ;;  %v40_v59 = vmul.f32 %v38_v57, %v38_v57 }
  0x19   :  { %v81_v9 = vpack.c.bf16 %v71_v8, %v70_v7  ;;  %v269_v23 = vmul.f32 %v70_v7, %v70_v7  ;;  %v270_v24 = vmul.f32 %v71_v8, %v71_v8  ;;  %v54_v63 = vand.u32 2147483647, %v37_v56 }
  0x1a   :  { %622 = vmatpush3.bf16.msra.mxu0 %v702_v2  ;;  %v183_v22 = vpack.c.bf16 %v75_v21, %v74_v20  ;;  %v357_v26 = vmul.f32 %v74_v20, %v74_v20  ;;  %v358_v27 = vmul.f32 %v75_v21, %v75_v21  ;;  %v445_v29 = vmul.f32 %v74_v20, %v70_v7 }
  0x1b   :  { %641 = vmatprep.subr.bf16.mxu0 %v744_v0  ;;  %v271_v25 = vpack.c.bf16 %v270_v24, %v269_v23  ;;  %v446_v30 = vmul.f32 %v75_v21, %v71_v8  ;;  %v42_v60 = vsel %vm41_vm1, %v39_v58, 0.0  ;;  %v43_v61 = vsel %vm41_vm1, %v40_v59, 0.0 }
  0x1c   :  { %v359_v28 = vpack.c.bf16 %v358_v27, %v357_v26  ;;  %v44_v62 = vadd.f32 %v43_v61, %v42_v60 }
  0x1d   :  { %624 = vmatmul.mubr.msk.bf16.vlgmr.msra.gmra.mrb[0].mxu0 %vm41_vm1, %v81_v9  ;;  %v447_v31 = vpack.c.bf16 %v446_v30, %v445_v29 }
  0x1e   :  { %643 = vmatprep.mubr.msk.bf16.mxu0 %vm745_vm0, %v744_v0  ;;  %45 = vadd.xlane.f32.xlu0 %v44_v62 }
  0xf0   :  { %v131_v10 = vpop.f32.mrb[0].mxu0 }
  0xf1   :  { %v625_v11 = vpop.f32.mrb[1].mxu0 }
  0xf2   :  { %v134_v14 = vpop.f32.mrb[2].mxu0 }
  0xf3   :  { %v138_v15 = vpack.c.bf16 %v134_v14, %v131_v10  ;;  %v626_v16 = vpop.f32.mrb[3].mxu0 }
  0xf5   :  { %628 = vmatpush3.bf16.msra.mxu1 %v138_v15 }
  0xf6   :  { %633 = vmatprep.subr.bf16.mxu1 %v744_v0 }
  0xf8   :  { %630 = vmatmul.mubr.msk.bf16.vlgmr.msra.gmra.mrb[0].mxu1 %vm139_vm2, %v822_v19 }
  0xf9   :  { %634 = vmatpush3.bf16.msra.mxu1 %v701_v1  ;;  %637 = vmatprep.mubr.msk.bf16.mxu1 %vm745_vm0, %v744_v0 }
  0xfa   :  { %635 = vmatprep.subr.bf16.mxu1 %v744_v0 }
  0xfd   :  { %636 = vmatpush3.bf16.msra.mxu1 %v702_v2 }
  0xfe   :  { %647 = vmatprep.subr.bf16.mxu1 %v744_v0 }
 0x100   :  { %638 = vmatmul.mubr.msk.bf16.vlgmr.msra.gmra.mrb[4].mxu1 %vm41_vm1, %v183_v22 }
 0x101   :  { %648 = vmatpush3.bf16.msra.mxu1 %v701_v1  ;;  %651 = vmatprep.mubr.msk.bf16.mxu1 %vm745_vm0, %v744_v0 }
 0x102   :  { %649 = vmatprep.subr.bf16.mxu1 %v744_v0 }
 0x105   :  { %650 = vmatpush3.bf16.msra.mxu1 %v702_v2 }
 0x106   :  { %661 = vmatprep.subr.bf16.mxu1 %v744_v0 }
 0x108   :  { %652 = vmatmul.mubr.msk.bf16.vlgmr.msra.gmra.mrb[8].mxu1 %vm41_vm1, %v271_v25 }
 0x109   :  { %662 = vmatpush3.bf16.msra.mxu1 %v701_v1  ;;  %665 = vmatprep.mubr.msk.bf16.mxu1 %vm745_vm0, %v744_v0 }
 0x10a   :  { %663 = vmatprep.subr.bf16.mxu1 %v744_v0 }
 0x10d   :  { %664 = vmatpush3.bf16.msra.mxu1 %v702_v2 }
 0x10e   :  { %675 = vmatprep.subr.bf16.mxu1 %v744_v0 }
 0x110   :  { %666 = vmatmul.mubr.msk.bf16.vlgmr.msra.gmra.mrb[12].mxu1 %vm41_vm1, %v359_v28 }
 0x111   :  { %676 = vmatpush3.bf16.msra.mxu1 %v701_v1  ;;  %679 = vmatprep.mubr.msk.bf16.mxu1 %vm745_vm0, %v744_v0  ;;  %v56_v1 = vsel %vm41_vm1, %v54_v63, 0.0 }
 0x112   :  { %677 = vmatprep.subr.bf16.mxu1 %v744_v0 }
 0x115   :  { %678 = vmatpush3.bf16.msra.mxu1 %v702_v2 }
 0x118   :  { %680 = vmatmul.mubr.msk.bf16.vlgmr.msra.gmra.mrb[16].mxu1 %vm41_vm1, %v447_v31 }
 0x1cb   :  { %v177_v32 = vpop.f32.mrb[0].mxu1 }
 0x1cc   :  { %v631_v33 = vpop.f32.mrb[1].mxu1  ;;  %v533_v6 = vmul.f32 %v177_v32, %v177_v32 }
 0x1cd   :  { %v180_v34 = vpop.f32.mrb[2].mxu1 }
 0x1ce   :  { %v632_v35 = vpop.f32.mrb[3].mxu1 }
 0x1d3   :  { %v221_v36 = vpop.f32.mrb[4].mxu1 }
 0x1d4   :  { %v639_v37 = vpop.f32.mrb[5].mxu1 }
 0x1d5   :  { %v224_v38 = vpop.f32.mrb[6].mxu1 }
 0x1d6   :  { %v228_v39 = vpack.c.bf16 %v224_v38, %v221_v36  ;;  %v640_v40 = vpop.f32.mrb[7].mxu1 }
 0x1d8   :  { %642 = vmatpush3.bf16.msra.mxu0 %v228_v39  ;;  %v46_v39 = vpop.xlane.xlu0 %45 }
 0x1d9   :  { %655 = vmatprep.subr.bf16.mxu0 %v744_v0  ;;  %v47_v40 = vrot.slane %v46_v39, 4 }
 0x1db   :  { %644 = vmatmul.mubr.msk.bf16.vlgmr.msra.gmra.mrb[4].mxu0 %vm139_vm2, %v822_v19  ;;  %v309_v41 = vpop.f32.mrb[8].mxu1 }
 0x1dc   :  { %v653_v42 = vpop.f32.mrb[9].mxu1  ;;  %657 = vmatprep.mubr.msk.bf16.mxu0 %vm745_vm0, %v744_v0 }
 0x1dd   :  { %v312_v43 = vpop.f32.mrb[10].mxu1 }
 0x1de   :  { %v316_v44 = vpack.c.bf16 %v312_v43, %v309_v41  ;;  %v654_v45 = vpop.f32.mrb[11].mxu1  ;;  %v48_v41 = vadd.f32 %v47_v40, %v46_v39 }
 0x1e0   :  { %656 = vmatpush3.bf16.msra.mxu0 %v316_v44  ;;  %v49_v43 = vrot.slane %v48_v41, 2 }
 0x1e1   :  { %669 = vmatprep.subr.bf16.mxu0 %v744_v0 }
 0x1e3   :  { %658 = vmatmul.mubr.msk.bf16.vlgmr.msra.gmra.mrb[8].mxu0 %vm139_vm2, %v822_v19  ;;  %v397_v46 = vpop.f32.mrb[12].mxu1 }
 0x1e4   :  { %v667_v47 = vpop.f32.mrb[13].mxu1  ;;  %671 = vmatprep.mubr.msk.bf16.mxu0 %vm745_vm0, %v744_v0 }
 0x1e5   :  { %v400_v48 = vpop.f32.mrb[14].mxu1 }
 0x1e6   :  { %v404_v49 = vpack.c.bf16 %v400_v48, %v397_v46  ;;  %v668_v50 = vpop.f32.mrb[15].mxu1  ;;  %v50_v46 = vadd.f32 %v49_v43, %v48_v41 }
 0x1e8   :  { %670 = vmatpush3.bf16.msra.mxu0 %v404_v49  ;;  %v51_v48 = vrot.slane %v50_v46, 1 }
 0x1e9   :  { %683 = vmatprep.subr.bf16.mxu0 %v744_v0 }
 0x1ea   :  { %v52_v50 = vadd.f32 %v51_v48, %v50_v46 }
 0x1eb   :  { %672 = vmatmul.mubr.msk.bf16.vlgmr.msra.gmra.mrb[12].mxu0 %vm139_vm2, %v822_v19  ;;  %v485_v51 = vpop.f32.mrb[16].mxu1 }
 0x1ec   :  { %v681_v52 = vpop.f32.mrb[17].mxu1  ;;  %685 = vmatprep.mubr.msk.bf16.mxu0 %vm745_vm0, %v744_v0  ;;  %v55_v0 = vand.u32 2147483647, %v38_v57  ;;  %689 = vpush %v52_v50 }
 0x1ed   :  { %v488_v53 = vpop.f32.mrb[18].mxu1 }
 0x1ee   :  { %v492_v54 = vpack.c.bf16 %v488_v53, %v485_v51  ;;  %v682_v55 = vpop.f32.mrb[19].mxu1  ;;  %v57_v2 = vsel %vm41_vm1, %v55_v0, 0.0 }
 0x1ef   :  { %v58_v5 = vadd.f32 %v57_v2, %v56_v1 }
 0x1f0   :  { %684 = vmatpush3.bf16.msra.mxu0 %v492_v54 }
 0x1f1   :  { %59 = vadd.xlane.f32.xlu0 %v58_v5 }
 0x1f3   :  { %686 = vmatmul.mubr.msk.bf16.vlgmr.msra.gmra.mrb[16].mxu0 %vm139_vm2, %v822_v19 }
 0x21d   :  { %s690_s3 = spop %689 }
 0x21e   :  { %552 = sst [smem:[#allocation5]] %s690_s3 }
 0x27e   :  { %v60_v42 = vpop.xlane.xlu0 %59 }
 0x27f   :  { %v61_v44 = vrot.slane %v60_v42, 4 }
 0x281   :  { %v62_v45 = vadd.f32 %v61_v44, %v60_v42 }
 0x283   :  { %v63_v47 = vrot.slane %v62_v45, 2 }
 0x285   :  { %v64_v49 = vadd.f32 %v63_v47, %v62_v45 }
 0x287   :  { %v65_v51 = vrot.slane %v64_v49, 1 }
 0x289   :  { %v66_v52 = vadd.f32 %v65_v51, %v64_v49 }
 0x28b   :  { %691 = vpush %v66_v52 }
 0x2ae   :  { %v263_v3 = vpop.f32.mrb[4].mxu0 }
 0x2af   :  { %v534_v7 = vmul.f32 %v263_v3, %v263_v3  ;;  %v535_v4 = vmul.f32 %v263_v3, %v177_v32  ;;  %v645_v8 = vpop.f32.mrb[5].mxu0 }
 0x2b0   :  { %v266_v9 = vpop.f32.mrb[6].mxu0 }
 0x2b1   :  { %v544_v10 = vadd.f32 %v534_v7, %v533_v6  ;;  %v646_v11 = vpop.f32.mrb[7].mxu0  ;;  %v539_v27 = vmul.f32 2.0, %v535_v4 }
 0x2b3   :  { %v545_v23 = vadd.f32 0.0001, %v544_v10  ;;  %v540_v33 = vadd.f32 0.0001, %v539_v27 }
 0x2b6   :  { %v351_v12 = vpop.f32.mrb[8].mxu0 }
 0x2b7   :  { %v536_v13 = vsub.f32 %v351_v12, %v533_v6  ;;  %v659_v14 = vpop.f32.mrb[9].mxu0 }
 0x2b8   :  { %v354_v15 = vpop.f32.mrb[10].mxu0 }
 0x2b9   :  { %v660_v16 = vpop.f32.mrb[11].mxu0 }
 0x2bc   :  { %s692_s10 = spop %691 }
 0x2bd   :  { %554 = sst [smem:[#allocation5 + $0x1]] %s692_s10 }
 0x2be   :  { %v439_v17 = vpop.f32.mrb[12].mxu0 }
 0x2bf   :  { %v537_v18 = vsub.f32 %v439_v17, %v534_v7  ;;  %v673_v19 = vpop.f32.mrb[13].mxu0 }
 0x2c0   :  { %v442_v20 = vpop.f32.mrb[14].mxu0 }
 0x2c1   :  { %v546_v21 = vadd.f32 %v537_v18, %v536_v13  ;;  %v674_v22 = vpop.f32.mrb[15].mxu0 }
 0x2c3   :  { %v547_v24 = vadd.f32 0.0009, %v546_v21 }
 0x2c5   :  { %v548_v25 = vmul.f32 %v547_v24, %v545_v23 }
 0x2c6   :  { %v527_v26 = vpop.f32.mrb[16].mxu0 }
 0x2c7   :  { %703 = vrcp.f32 %v548_v25  ;;  %v538_v28 = vsub.f32 %v527_v26, %v535_v4  ;;  %v687_v29 = vpop.f32.mrb[17].mxu0 }
 0x2c8   :  { %v530_v30 = vpop.f32.mrb[18].mxu0 }
 0x2c9   :  { %v541_v31 = vmul.f32 2.0, %v538_v28  ;;  %v688_v32 = vpop.f32.mrb[19].mxu0 }
 0x2cb   :  { %v542_v34 = vadd.f32 0.0009, %v541_v31 }
 0x2cd   :  { %v543_v35 = vmul.f32 %v542_v34, %v540_v33 }
 0x2d1   :  { %v704_v36 = vpop.eup %703 }
 0x2d2   :  { %v550_v37 = vmul.f32 %v704_v36, %v543_v35 }
 0x2d4   :  { %v556_v38 = vsel %vm555_vm3, %v550_v37, 0.0 }
 0x2d5   :  { %557 = vadd.xlane.f32.xlu1 %v556_v38 }
 0x362   :  { %v558_v53 = vpop.xlane.xlu1 %557 }
 0x363   :  { %v559_v54 = vrot.slane %v558_v53, 4 }
 0x365   :  { %v560_v55 = vadd.f32 %v559_v54, %v558_v53 }
 0x367   :  { %v561_v56 = vrot.slane %v560_v55, 2 }
 0x369   :  { %v562_v57 = vadd.f32 %v561_v56, %v560_v55 }
 0x36b   :  { %v563_v58 = vrot.slane %v562_v57, 1 }
 0x36d   :  { %v564_v59 = vadd.f32 %v563_v58, %v562_v57 }
 0x36f   :  { %693 = vpush %v564_v59 }
 0x3a0   :  { %s694_s11 = spop %693 }
 0x3a1   :  { %567 = sst [smem:[#allocation5 + $0x2]] %s694_s11 }
 0x3a2   :  { %736 = shalt.err (!%p733_p10)
}
 0x3a3   :  { %s746_s19 = smov [#allocation5]  }
 0x3a4   :  { %575 = dma.smem_to_hbm %s746_s19, 16, %s887_s4, [#allocation4]  }
 0x3a5   :  { %739 = dma.done.wait [#allocation4], 16  }
 0x3a6   :  { %740 = vsyncadd [#allocation4], 4294967280 }
 0x3a7   :  { %579 = sfence }
 0x3a8   :  { %580 = vsyncpa [#allocation3], 1 }
 0x3a9   :  { %581 = vsyncpa [#allocation4], 1 }

</bundles_post_ra>
